<compile_context>
chip_gen: v5e
topology: v5e:2x2
jax: 0.10.0
libtpu: 0.0.40
codegen_flags: <defaults>
</compile_context>

<pallas_src>
import functools

import jax
import jax.numpy as jnp
from jax.experimental import pallas as pl
from jax.experimental.pallas import tpu as pltpu


def _adaptive_align_kernel(xs_ref, xt_ref, w_ref, bW_ref, hw_ref, out_ref,
                           *, inv_feat_dim):
    """Fused attention-align loss.

    xs_ref : (D, N) f32    source features, native layout (D = feat_dim*seq_len)
    xt_ref : (D, N) f32    target features
    w_ref  : (K, D) bf16   W.weight, contraction dim pre-reordered to (f, t)
    bW_ref : (K, 1) f32    W.bias (column)
    hw_ref : (K, 1) f32    h.weight (column)
    out_ref: (1, 1) f32    L_align (SMEM scalar)
    """
    w = w_ref[...]
    bW = bW_ref[...]
    hw = hw_ref[...]

    def centroid(x_ref):
        x = x_ref[...]                                             # (D, N) f32
        # One MXU matmul per domain: bf16 operands, f32 accumulation.
        # hidden^T is (K, N): pedestrians on lanes.
        h = jnp.tanh(
            jnp.dot(w, x.astype(jnp.bfloat16),
                    preferred_element_type=jnp.float32) + bW)      # (K, N) f32
        # Width-1 projection on the VPU/XLU (sublane reduce); h.bias dropped
        # because softmax is shift-invariant (exact no-op).
        s = jnp.sum(h * hw, axis=0, keepdims=True)                 # (1, N) f32
        # Per-domain softmax over the (lane) pedestrian axis.
        m = jnp.max(s, axis=-1, keepdims=True)
        e = jnp.exp(s - m)
        beta = e * pl.reciprocal(jnp.sum(e, axis=-1, keepdims=True),
                                 approx=True)                      # (1, N)
        # Centroid with f32 features (avoids bf16 cancellation in c_s - c_t).
        return jnp.sum(x * beta, axis=-1, keepdims=True)           # (D, 1) f32

    diff = centroid(xs_ref) - centroid(xt_ref)                     # (D, 1)
    out_ref[0, 0] = jnp.sqrt(jnp.sum(diff * diff)) * inv_feat_dim


def prepare_params(params, *, feat_dim, seq_len):
    """One-time weight prep, hoisted out of the per-call hot path.

    Re-orders W.weight's contraction dim from the module's (t, f) flattening to
    the native (f, t) feature layout, and casts the MXU operand to bf16.
    """
    D = feat_dim * seq_len
    w = params["W_weight"].reshape(feat_dim, seq_len, feat_dim)    # (K, T, F)
    w = jnp.transpose(w, (0, 2, 1)).reshape(feat_dim, D)           # (K, F*T)
    return {
        "w": w.astype(jnp.bfloat16),                                        # (K, D)
        "bW": params["W_bias"].reshape(feat_dim, 1).astype(jnp.float32),    # (K, 1)
        "hw": params["h_weight"].reshape(feat_dim, 1).astype(jnp.float32),  # (K, 1)
        # h_bias intentionally unused: softmax(s + c) == softmax(s).
    }


@functools.partial(jax.jit, static_argnames=("feat_dim", "seq_len"))
def adaptive_learning_forward(Fs, Ft, prepped, *, feat_dim, seq_len):
    """Fs, Ft: (1, feat_dim, T_obs, num_peds) — the module's native layout."""
    b, f, t, n = Fs.shape
    assert b == 1, "per-domain softmax would mix batches; batch must be 1"
    assert f == feat_dim and t == seq_len
    D = feat_dim * seq_len

    # Pure bitcast: (1, F, T, N) -> (F*T, N).  No permute, no copy, no HLO work.
    xs = Fs.reshape(D, n)
    xt = Ft.reshape(D, n)

    vmem = pl.BlockSpec(memory_space=pltpu.MemorySpace.VMEM)
    smem = pl.BlockSpec(memory_space=pltpu.MemorySpace.SMEM)

    # Single block, no grid / pipelining: total footprint ~50 KiB, far under
    # the scoped-VMEM default on v5e / v6e / v7x.
    out = pl.pallas_call(
        functools.partial(_adaptive_align_kernel,
                          inv_feat_dim=1.0 / float(feat_dim)),
        out_shape=jax.ShapeDtypeStruct((1, 1), jnp.float32),
        in_specs=[vmem, vmem, vmem, vmem, vmem],
        out_specs=smem,
    )(xs, xt, prepped["w"], prepped["bW"], prepped["hw"])
    return out[0, 0]


def _reference_jax(Fs, Ft, params, *, feat_dim, seq_len):
    """Pure-JAX f32 reference mirroring the PyTorch forward exactly."""
    def flatten(x):
        x = jnp.transpose(x, (0, 3, 2, 1))
        b, n, t, f = x.shape
        return x.reshape(b, n, t * f)

    fs = flatten(Fs).astype(jnp.float32)
    ft = flatten(Ft).astype(jnp.float32)

    def beta(x):
        h = jnp.tanh(x @ params["W_weight"].T + params["W_bias"])
        s = h @ params["h_weight"].T + params["h_bias"]
        return jax.nn.softmax(s, axis=1)

    c_s = jnp.einsum('ijh,ijk->k', beta(fs), fs)
    c_t = jnp.einsum('ijh,ijk->k', beta(ft), ft)
    return jnp.linalg.norm(c_s - c_t) / feat_dim


if __name__ == "__main__":
    feat_dim = 32
    seq_len = 8       # T_obs
    num_peds = 16
    D = feat_dim * seq_len

    key = jax.random.PRNGKey(0)
    k_fs, k_ft, k_w, k_bw, k_h, k_bh = jax.random.split(key, 6)

    # Inputs in the module's native layout: (1, feat_dim, T_obs, num_peds)
    Fs = jax.random.normal(k_fs, (1, feat_dim, seq_len, num_peds), jnp.float32)
    Ft = jax.random.normal(k_ft, (1, feat_dim, seq_len, num_peds), jnp.float32)

    # Deterministic parameter init (shapes from nn.Linear in __init__)
    params = {
        "W_weight": jax.random.normal(k_w, (feat_dim, D), jnp.float32) * 0.05,
        "W_bias":   jax.random.normal(k_bw, (feat_dim,), jnp.float32) * 0.05,
        "h_weight": jax.random.normal(k_h, (1, feat_dim), jnp.float32) * 0.05,
        "h_bias":   jax.random.normal(k_bh, (1,), jnp.float32) * 0.05,
    }

    # Weight prep hoisted once, outside the hot path.
    prepped = prepare_params(params, feat_dim=feat_dim, seq_len=seq_len)

    out = adaptive_learning_forward(Fs, Ft, prepped,
                                    feat_dim=feat_dim, seq_len=seq_len)
    out = jax.block_until_ready(out)

    ref = _reference_jax(Fs, Ft, params, feat_dim=feat_dim, seq_len=seq_len)
    ref = jax.block_until_ready(ref)
    # bf16 MXU operands (W matmul only) vs. the f32 reference.
    assert jnp.allclose(out, ref, rtol=2e-2, atol=2e-3), (out, ref)

    print("KERNEL_OK")
</pallas_src>

<mosaic_0001>
module attributes {stable_mosaic.version = 11 : i64} {
  func.func @_adaptive_align_kernel(%arg0: memref<256x16xf32, #tpu.memory_space<vmem>>, %arg1: memref<256x16xf32, #tpu.memory_space<vmem>>, %arg2: memref<32x256xbf16, #tpu.memory_space<vmem>>, %arg3: memref<32x1xf32, #tpu.memory_space<vmem>>, %arg4: memref<32x1xf32, #tpu.memory_space<vmem>>, %arg5: memref<1x1xf32, #tpu.memory_space<smem>>) attributes {dimension_semantics = [], scalar_prefetch = 0 : i64, scratch_operands = 0 : i64, tpu.core_type = #tpu.core_type<tc>} {
    %c0 = arith.constant 0 : index
    %c0_0 = arith.constant 0 : index
    %0 = vector.load %arg2[%c0, %c0_0] : memref<32x256xbf16, #tpu.memory_space<vmem>>, vector<32x256xbf16>
    %c0_1 = arith.constant 0 : index
    %c0_2 = arith.constant 0 : index
    %1 = vector.load %arg3[%c0_1, %c0_2] : memref<32x1xf32, #tpu.memory_space<vmem>>, vector<32x1xf32>
    %c0_3 = arith.constant 0 : index
    %c0_4 = arith.constant 0 : index
    %2 = vector.load %arg4[%c0_3, %c0_4] : memref<32x1xf32, #tpu.memory_space<vmem>>, vector<32x1xf32>
    %c0_5 = arith.constant 0 : index
    %c0_6 = arith.constant 0 : index
    %3 = vector.load %arg0[%c0_5, %c0_6] : memref<256x16xf32, #tpu.memory_space<vmem>>, vector<256x16xf32>
    %4 = arith.truncf %3 : vector<256x16xf32> to vector<256x16xbf16>
    %cst = arith.constant dense<0.000000e+00> : vector<32x16xf32>
    %5 = tpu.matmul %0, %4, %cst {dimension_numbers = #tpu.dot_dimension_numbers<[1], [0], [0], [1], [0, 0, 1, 1], [], []>} : vector<32x256xbf16>, vector<256x16xbf16>, vector<32x16xf32> -> vector<32x16xf32>
    %6 = vector.broadcast %1 : vector<32x1xf32> to vector<32x16xf32>
    %7 = arith.addf %5, %6 : vector<32x16xf32>
    %8 = math.tanh %7 : vector<32x16xf32>
    %9 = vector.broadcast %2 : vector<32x1xf32> to vector<32x16xf32>
    %10 = arith.mulf %8, %9 : vector<32x16xf32>
    %cst_7 = arith.constant dense<0.000000e+00> : vector<16xf32>
    %11 = vector.multi_reduction <add>, %10, %cst_7 [0] : vector<32x16xf32> to vector<16xf32>
    %12 = vector.shape_cast %11 : vector<16xf32> to vector<1x16xf32>
    %cst_8 = arith.constant dense<0xFF800000> : vector<1xf32>
    %13 = vector.multi_reduction <maximumf>, %12, %cst_8 [1] : vector<1x16xf32> to vector<1xf32>
    %14 = vector.shape_cast %13 : vector<1xf32> to vector<1x1xf32>
    %15 = vector.broadcast %14 : vector<1x1xf32> to vector<1x16xf32>
    %16 = arith.subf %12, %15 : vector<1x16xf32>
    %17 = math.exp %16 : vector<1x16xf32>
    %cst_9 = arith.constant dense<0.000000e+00> : vector<1xf32>
    %18 = vector.multi_reduction <add>, %17, %cst_9 [1] : vector<1x16xf32> to vector<1xf32>
    %19 = vector.shape_cast %18 : vector<1xf32> to vector<1x1xf32>
    %20 = tpu.reciprocal %19 {approx = true} : vector<1x1xf32> -> vector<1x1xf32>
    %21 = vector.broadcast %20 : vector<1x1xf32> to vector<1x16xf32>
    %22 = arith.mulf %17, %21 : vector<1x16xf32>
    %23 = vector.broadcast %22 : vector<1x16xf32> to vector<256x16xf32>
    %24 = arith.mulf %3, %23 : vector<256x16xf32>
    %cst_10 = arith.constant dense<0.000000e+00> : vector<256xf32>
    %25 = vector.multi_reduction <add>, %24, %cst_10 [1] : vector<256x16xf32> to vector<256xf32>
    %26 = vector.shape_cast %25 : vector<256xf32> to vector<256x1xf32>
    %c0_11 = arith.constant 0 : index
    %c0_12 = arith.constant 0 : index
    %27 = vector.load %arg1[%c0_11, %c0_12] : memref<256x16xf32, #tpu.memory_space<vmem>>, vector<256x16xf32>
    %28 = arith.truncf %27 : vector<256x16xf32> to vector<256x16xbf16>
    %cst_13 = arith.constant dense<0.000000e+00> : vector<32x16xf32>
    %29 = tpu.matmul %0, %28, %cst_13 {dimension_numbers = #tpu.dot_dimension_numbers<[1], [0], [0], [1], [0, 0, 1, 1], [], []>} : vector<32x256xbf16>, vector<256x16xbf16>, vector<32x16xf32> -> vector<32x16xf32>
    %30 = vector.broadcast %1 : vector<32x1xf32> to vector<32x16xf32>
    %31 = arith.addf %29, %30 : vector<32x16xf32>
    %32 = math.tanh %31 : vector<32x16xf32>
    %33 = vector.broadcast %2 : vector<32x1xf32> to vector<32x16xf32>
    %34 = arith.mulf %32, %33 : vector<32x16xf32>
    %cst_14 = arith.constant dense<0.000000e+00> : vector<16xf32>
    %35 = vector.multi_reduction <add>, %34, %cst_14 [0] : vector<32x16xf32> to vector<16xf32>
    %36 = vector.shape_cast %35 : vector<16xf32> to vector<1x16xf32>
    %cst_15 = arith.constant dense<0xFF800000> : vector<1xf32>
    %37 = vector.multi_reduction <maximumf>, %36, %cst_15 [1] : vector<1x16xf32> to vector<1xf32>
    %38 = vector.shape_cast %37 : vector<1xf32> to vector<1x1xf32>
    %39 = vector.broadcast %38 : vector<1x1xf32> to vector<1x16xf32>
    %40 = arith.subf %36, %39 : vector<1x16xf32>
    %41 = math.exp %40 : vector<1x16xf32>
    %cst_16 = arith.constant dense<0.000000e+00> : vector<1xf32>
    %42 = vector.multi_reduction <add>, %41, %cst_16 [1] : vector<1x16xf32> to vector<1xf32>
    %43 = vector.shape_cast %42 : vector<1xf32> to vector<1x1xf32>
    %44 = tpu.reciprocal %43 {approx = true} : vector<1x1xf32> -> vector<1x1xf32>
    %45 = vector.broadcast %44 : vector<1x1xf32> to vector<1x16xf32>
    %46 = arith.mulf %41, %45 : vector<1x16xf32>
    %47 = vector.broadcast %46 : vector<1x16xf32> to vector<256x16xf32>
    %48 = arith.mulf %27, %47 : vector<256x16xf32>
    %cst_17 = arith.constant dense<0.000000e+00> : vector<256xf32>
    %49 = vector.multi_reduction <add>, %48, %cst_17 [1] : vector<256x16xf32> to vector<256xf32>
    %50 = vector.shape_cast %49 : vector<256xf32> to vector<256x1xf32>
    %51 = arith.subf %26, %50 : vector<256x1xf32>
    %52 = arith.mulf %51, %51 : vector<256x1xf32>
    %53 = vector.shape_cast %52 : vector<256x1xf32> to vector<1x256x1xf32>
    %cst_18 = arith.constant dense<0.000000e+00> : vector<1xf32>
    %54 = vector.multi_reduction <add>, %53, %cst_18 [1, 2] : vector<1x256x1xf32> to vector<1xf32>
    %55 = vector.shape_cast %54 : vector<1xf32> to vector<1x1x1xf32>
    %56 = vector.extract %55[0, 0, 0] : f32 from vector<1x1x1xf32>
    %57 = math.sqrt %56 : f32
    %cst_19 = arith.constant 3.125000e-02 : f32
    %58 = arith.mulf %57, %cst_19 : f32
    %c0_20 = arith.constant 0 : index
    %c0_21 = arith.constant 0 : index
    %59 = memref.load %arg5[%c0_20, %c0_21] : memref<1x1xf32, #tpu.memory_space<smem>>
    memref.store %58, %arg5[%c0_20, %c0_21] : memref<1x1xf32, #tpu.memory_space<smem>>
    return
  }
}

</mosaic_0001>

<bundles_post_ra>
// kernel: adaptive_learning_forward.1
= control target key start
LH: loop header
LB: loop body
LE: loop exit
PB: predicated region body
PF: predicated region fallthrough
CT: control target
= control target key end

     0   :  { %v824_v25 = vmov 0   ;;  %s1628_s0 = inlined_call_operand.vmem [shape: f32[256,16], index: 0, kind: input, shape index: {}]   ;;  %s1629_s1 = inlined_call_operand.vmem [shape: f32[256,16], index: 1, kind: input, shape index: {}]   ;;  %s1630_s2 = inlined_call_operand.vmem [shape: bf16[32,256], index: 2, kind: input, shape index: {}]   ;;  %s1631_s3 = inlined_call_operand.vmem [shape: f32[32,1], index: 3, kind: input, shape index: {}]   ;;  %s1632_s4 = inlined_call_operand.vmem [shape: f32[32,1], index: 4, kind: input, shape index: {}]   ;;  %s1633_s5 = inlined_call_operand.hbm [shape: f32[1,1], index: 5, kind: output, shape index: {}]  }
   0x1   :  { %v859_v0 = vld [vmem:[%s1628_s0 + $0x70] sm:$0xff]  ;;  %v864_v1 = vld [vmem:[%s1628_s0 + $0x78] sm:$0xff]  ;;  %v905_v11 = vld [vmem:[%s1628_s0 + $0x60] sm:$0xff]  ;;  %781 = vset.pattern.permute.xlu0 %v824_v25  ;;  %782 = vset.pattern.permute.xlu1 %v824_v25 }
   0x2   :  { %v869_v2 = vld [vmem:[%s1628_s0 + $0xf0] sm:$0xff]  ;;  %v72_v3 = vpack.c.bf16 %v864_v1, %v859_v0  ;;  %v876_v4 = vld [vmem:[%s1628_s0 + $0xf8] sm:$0xff]  ;;  %v912_v13 = vld [vmem:[%s1628_s0 + $0x68] sm:$0xff]  ;;  %783 = vset.pattern.permute.xlu2 %v824_v25 }
   0x3   :  { %1662 = vst [vmem:[#allocation5_spill] sm:$0xff] %v876_v4  ;;  %v881_v5 = vld [vmem:[%s1629_s1 + $0x70] sm:$0xff]  ;;  %v886_v6 = vld [vmem:[%s1629_s1 + $0x78] sm:$0xff]  ;;  %v80_v7 = vpack.c.bf16 %v876_v4, %v869_v2  ;;  %v917_v14 = vld [vmem:[%s1628_s0 + $0xe0] sm:$0xff]  ;;  %v71_v16 = vpack.c.bf16 %v912_v13, %v905_v11 }
   0x4   :  { %1663 = vst [vmem:[#allocation6_spill] sm:$0xff] %v881_v5  ;;  %v379_v8 = vpack.c.bf16 %v886_v6, %v881_v5  ;;  %v895_v9 = vld [vmem:[%s1629_s1 + $0xf0] sm:$0xff]  ;;  %v900_v10 = vld [vmem:[%s1629_s1 + $0xf8] sm:$0xff]  ;;  %121 = vmatpush.bf16.msra.mxu0 %v72_v3  ;;  %v922_v15 = vld [vmem:[%s1628_s0 + $0xe8] sm:$0xff] }
   0x5   :  { %1664 = vst [vmem:[#allocation7_spill] sm:$0xff] %v886_v6  ;;  %v387_v12 = vpack.c.bf16 %v900_v10, %v895_v9  ;;  %140 = vmatpush.bf16.msra.mxu1 %v80_v7  ;;  %v79_v17 = vpack.c.bf16 %v922_v15, %v917_v14  ;;  %v931_v18 = vld [vmem:[%s1629_s1 + $0x60] sm:$0xff]  ;;  %v936_v19 = vld [vmem:[%s1629_s1 + $0x68] sm:$0xff]  ;;  %v953_v23 = vld [vmem:[%s1628_s0 + $0x50] sm:$0xff] }
   0x6   :  { %1665 = vst [vmem:[#allocation8_spill] sm:$0xff] %v895_v9  ;;  %388 = vmatpush.bf16.msra.mxu2 %v379_v8  ;;  %v941_v20 = vld [vmem:[%s1629_s1 + $0xe0] sm:$0xff]  ;;  %v378_v21 = vpack.c.bf16 %v936_v19, %v931_v18  ;;  %v948_v22 = vld [vmem:[%s1629_s1 + $0xe8] sm:$0xff]  ;;  %v958_v24 = vld [vmem:[%s1628_s0 + $0x58] sm:$0xff] }
   0x7   :  { %1666 = vst [vmem:[#allocation9_spill] sm:$0xff] %v900_v10  ;;  %407 = vmatpush.bf16.msra.mxu3 %v387_v12  ;;  %v386_v26 = vpack.c.bf16 %v948_v22, %v941_v20  ;;  %v965_v27 = vld [vmem:[%s1628_s0 + $0xd0] sm:$0xff]  ;;  %v970_v28 = vld [vmem:[%s1628_s0 + $0xd8] sm:$0xff]  ;;  %v70_v30 = vpack.c.bf16 %v958_v24, %v953_v23  ;;  %v1001_v36 = vld [vmem:[%s1628_s0 + $0x40] sm:$0xff] }
   0x8   :  { %1667 = vst [vmem:[#allocation10_spill] sm:$0xff] %v931_v18  ;;  %v975_v29 = vld [vmem:[%s1629_s1 + $0x50] sm:$0xff]  ;;  %122 = vmatpush.bf16.msra.mxu0 %v71_v16  ;;  %v982_v31 = vld [vmem:[%s1629_s1 + $0x58] sm:$0xff]  ;;  %v78_v34 = vpack.c.bf16 %v970_v28, %v965_v27  ;;  %v1006_v37 = vld [vmem:[%s1628_s0 + $0x48] sm:$0xff] }
   0x9   :  { %1668 = vst [vmem:[#allocation11_spill] sm:$0xff] %v936_v19  ;;  %v987_v32 = vld [vmem:[%s1629_s1 + $0xd0] sm:$0xff]  ;;  %v992_v33 = vld [vmem:[%s1629_s1 + $0xd8] sm:$0xff]  ;;  %141 = vmatpush.bf16.msra.mxu1 %v79_v17  ;;  %v377_v35 = vpack.c.bf16 %v982_v31, %v975_v29  ;;  %v1011_v38 = vld [vmem:[%s1628_s0 + $0xc0] sm:$0xff]  ;;  %v69_v45 = vpack.c.bf16 %v1006_v37, %v1001_v36 }
   0xa   :  { %1669 = vst [vmem:[#allocation12_spill] sm:$0xff] %v941_v20  ;;  %389 = vmatpush.bf16.msra.mxu2 %v378_v21  ;;  %v385_v39 = vpack.c.bf16 %v992_v33, %v987_v32  ;;  %v1018_v40 = vld [vmem:[%s1628_s0 + $0xc8] sm:$0xff]  ;;  %v1023_v41 = vld [vmem:[%s1629_s1 + $0x40] sm:$0xff]  ;;  %v1049_v48 = vld [vmem:[%s1628_s0 + $0x30] sm:$0xff] }
   0xb   :  { %1670 = vst [vmem:[#allocation13_spill] sm:$0xff] %v948_v22  ;;  %408 = vmatpush.bf16.msra.mxu3 %v386_v26  ;;  %v1028_v42 = vld [vmem:[%s1629_s1 + $0x48] sm:$0xff]  ;;  %v1033_v43 = vld [vmem:[%s1629_s1 + $0xc0] sm:$0xff]  ;;  %v77_v46 = vpack.c.bf16 %v1018_v40, %v1011_v38  ;;  %v1054_v49 = vld [vmem:[%s1628_s0 + $0x38] sm:$0xff] }
   0xc   :  { %1671 = vst [vmem:[#allocation14_spill] sm:$0xff] %v975_v29  ;;  %v1038_v44 = vld [vmem:[%s1629_s1 + $0xc8] sm:$0xff]  ;;  %123 = vmatpush.bf16.msra.mxu0 %v70_v30  ;;  %v376_v47 = vpack.c.bf16 %v1028_v42, %v1023_v41  ;;  %v1059_v50 = vld [vmem:[%s1628_s0 + $0xb0] sm:$0xff]  ;;  %v1066_v52 = vld [vmem:[%s1628_s0 + $0xb8] sm:$0xff]  ;;  %v68_v57 = vpack.c.bf16 %v1054_v49, %v1049_v48 }
   0xd   :  { %1672 = vst [vmem:[#allocation15_spill] sm:$0xff] %v982_v31  ;;  %142 = vmatpush.bf16.msra.mxu1 %v78_v34  ;;  %v384_v51 = vpack.c.bf16 %v1038_v44, %v1033_v43  ;;  %v1071_v53 = vld [vmem:[%s1629_s1 + $0x30] sm:$0xff]  ;;  %v1076_v54 = vld [vmem:[%s1629_s1 + $0x38] sm:$0xff]  ;;  %v76_v58 = vpack.c.bf16 %v1066_v52, %v1059_v50  ;;  %v1097_v60 = vld [vmem:[%s1628_s0 + $0x20] sm:$0xff] }
   0xe   :  { %1673 = vst [vmem:[#allocation16_spill] sm:$0xff] %v987_v32  ;;  %390 = vmatpush.bf16.msra.mxu2 %v377_v35  ;;  %v1081_v55 = vld [vmem:[%s1629_s1 + $0xb0] sm:$0xff]  ;;  %v1086_v56 = vld [vmem:[%s1629_s1 + $0xb8] sm:$0xff]  ;;  %v375_v59 = vpack.c.bf16 %v1076_v54, %v1071_v53  ;;  %v1102_v61 = vld [vmem:[%s1628_s0 + $0x28] sm:$0xff] }
   0xf   :  { %1674 = vst [vmem:[#allocation17_spill] sm:$0xff] %v992_v33  ;;  %409 = vmatpush.bf16.msra.mxu3 %v385_v39  ;;  %v1107_v62 = vld [vmem:[%s1628_s0 + $0xa0] sm:$0xff]  ;;  %v383_v63 = vpack.c.bf16 %v1086_v56, %v1081_v55  ;;  %v1114_v3 = vld [vmem:[%s1628_s0 + $0xa8] sm:$0xff]  ;;  %v67_v17 = vpack.c.bf16 %v1102_v61, %v1097_v60  ;;  %v1145_v26 = vld [vmem:[%s1628_s0 + $0x10] sm:$0xff] }
  0x10   :  { %1675 = vst [vmem:[#allocation18_spill] sm:$0xff] %v1023_v41  ;;  %124 = vmatpush.bf16.msra.mxu0 %v69_v45  ;;  %v1119_v7 = vld [vmem:[%s1629_s1 + $0x20] sm:$0xff]  ;;  %v1124_v8 = vld [vmem:[%s1629_s1 + $0x28] sm:$0xff]  ;;  %v75_v21 = vpack.c.bf16 %v1114_v3, %v1107_v62  ;;  %v1150_v30 = vld [vmem:[%s1628_s0 + $0x18] sm:$0xff] }
  0x11   :  { %1676 = vst [vmem:[#allocation19_spill] sm:$0xff] %v1028_v42  ;;  %143 = vmatpush.bf16.msra.mxu1 %v77_v46  ;;  %v1129_v12 = vld [vmem:[%s1629_s1 + $0xa0] sm:$0xff]  ;;  %v1134_v16 = vld [vmem:[%s1629_s1 + $0xa8] sm:$0xff]  ;;  %v374_v25 = vpack.c.bf16 %v1124_v8, %v1119_v7  ;;  %v1155_v34 = vld [vmem:[%s1628_s0 + $0x90] sm:$0xff] }
  0x12   :  { %1677 = vst [vmem:[#allocation20_spill] sm:$0xff] %v1033_v43  ;;  %391 = vmatpush.bf16.msra.mxu2 %v376_v47  ;;  %v382_v35 = vpack.c.bf16 %v1134_v16, %v1129_v12  ;;  %v1162_v39 = vld [vmem:[%s1628_s0 + $0x98] sm:$0xff]  ;;  %v1167_v45 = vld [vmem:[%s1629_s1 + $0x10] sm:$0xff]  ;;  %v1204_v20 = vld [vmem:[%s1628_s0 + $0x8] sm:$0xff] }
  0x13   :  { %1678 = vst [vmem:[#allocation21_spill] sm:$0xff] %v1038_v44  ;;  %410 = vmatpush.bf16.msra.mxu3 %v384_v51  ;;  %v1172_v46 = vld [vmem:[%s1629_s1 + $0x18] sm:$0xff]  ;;  %v1177_v47 = vld [vmem:[%s1629_s1 + $0x90] sm:$0xff]  ;;  %v74_v10 = vpack.c.bf16 %v1162_v39, %v1155_v34  ;;  %v1221_v9 = vld [vmem:[%s1629_s1] sm:$0xff] }
  0x14   :  { %1679 = vst [vmem:[#allocation22_spill] sm:$0xff] %v1071_v53  ;;  %125 = vmatpush.bf16.msra.mxu0 %v68_v57  ;;  %v1182_v51 = vld [vmem:[%s1629_s1 + $0x98] sm:$0xff]  ;;  %v25_v57 = vld [vmem:[%s1631_s3] sm:$0xff]  ;;  %v1226_v4 = vld [vmem:[%s1629_s1 + $0x8] sm:$0xff] }
  0x15   :  { %1680 = vst [vmem:[#allocation23_spill] sm:$0xff] %v1076_v54  ;;  %144 = vmatpush.bf16.msra.mxu1 %v76_v58  ;;  %v66_v58 = vpack.c.bf16 %v1150_v30, %v1145_v26  ;;  %83 = vperm.xlu0 %781, %v25_v57   ;;  %v1209_v57 = vld [vmem:[%s1628_s0 + $0x80] sm:$0xff] }
  0x16   :  { %1681 = vst [vmem:[#allocation24_spill] sm:$0xff] %v1081_v55  ;;  %392 = vmatpush.bf16.msra.mxu2 %v375_v59  ;;  %v1192_v59 = vld [vmem:[%s1628_s0] sm:$0xff] }
  0x17   :  { %1682 = vst [vmem:[#allocation25_spill] sm:$0xff] %v1086_v56  ;;  %411 = vmatpush.bf16.msra.mxu3 %v383_v63  ;;  %v27_v63 = vld [vmem:[%s1631_s3 + $0x10] sm:$0xff]  ;;  %v1231_v44 = vld [vmem:[%s1629_s1 + $0x80] sm:$0xff] }
  0x18   :  { %1683 = vst [vmem:[#allocation26_spill] sm:$0xff] %v1119_v7  ;;  %126 = vmatpush.bf16.msra.mxu0 %v67_v17  ;;  %v373_v17 = vpack.c.bf16 %v1172_v46, %v1167_v45  ;;  %93 = vperm.xlu1 %782, %v27_v63   ;;  %v29_v22 = vld [vmem:[%s1632_s4] sm:$0xff] }
  0x19   :  { %1684 = vst [vmem:[#allocation27_spill] sm:$0xff] %v1129_v12  ;;  %145 = vmatpush.bf16.msra.mxu1 %v75_v21  ;;  %v1214_v21 = vld [vmem:[%s1628_s0 + $0x88] sm:$0xff] }
  0x1a   :  { %1685 = vst [vmem:[#allocation28_spill] sm:$0xff] %v1134_v16  ;;  %393 = vmatpush.bf16.msra.mxu2 %v374_v25  ;;  %v381_v25 = vpack.c.bf16 %v1182_v51, %v1177_v47 }
  0x1b   :  { %1686 = vst [vmem:[#allocation29_spill] sm:$0xff] %v1177_v47  ;;  %412 = vmatpush.bf16.msra.mxu3 %v382_v35  ;;  %v1236_v35 = vld [vmem:[%s1629_s1 + $0x88] sm:$0xff] }
  0x1c   :  { %1687 = vst [vmem:[#allocation30_spill] sm:$0xff] %v1182_v51 }
  0x1d   :  { %1688 = vst [vmem:[#allocation31_spill] sm:$0xff] %v1231_v44 }
  0x1e   :  { %1689 = vst [vmem:[#allocation32_spill] sm:$0xff] %v1236_v35 }
  0x1f   :  { %10 = vsyncpa [#allocation3], 0  ;;  %127 = vmatpush.bf16.msra.mxu0 %v66_v58  ;;  %v65_v33 = vpack.c.bf16 %v1204_v20, %v1192_v59  ;;  %v757_v55 = vld [vmem:[%s1630_s2] sm:$0xf]  ;;  %v772_v63 = vld [vmem:[%s1630_s2 + $0x4] sm:$0xf0]  ;;  %165 = vperm.xlu2 %783, %v29_v22   ;;  %v73_v32 = vpack.c.bf16 %v1214_v21, %v1209_v57  ;;  %v372_v58 = vpack.c.bf16 %v1226_v4, %v1221_v9 }
  0x20   :  { %146 = vmatpush.bf16.msra.mxu1 %v74_v10  ;;  %394 = vmatpush.bf16.msra.mxu2 %v373_v17  ;;  %v771_v43 = vld [vmem:[%s1630_s2 + $0x4] sm:$0xf]  ;;  %v759_v51 = vld [vmem:[%s1630_s2 + $0x8] sm:$0xf0]  ;;  %v380_v10 = vpack.c.bf16 %v1236_v35, %v1231_v44  ;;  %v758_v17 = vor.u32 %v772_v63, %v757_v55  ;;  %v28_v56 = vld [vmem:[%s1631_s3 + $0x18] sm:$0xff]  ;;  %vm187_vm0 = vcmask 130048  }
  0x21   :  { %v26_v22 = vld [vmem:[%s1631_s3 + $0x8] sm:$0xff]  ;;  %413 = vmatpush.bf16.msra.mxu3 %v381_v25  ;;  %v762_v16 = vor.u32 %v771_v43, %v759_v51  ;;  %98 = vperm.xlu1 %782, %v28_v56   ;;  %v31_v55 = vld [vmem:[%s1632_s4 + $0x10] sm:$0xff]  ;;  %v774_v43 = vld [vmem:[%s1630_s2 + $0x14] sm:$0xf0]  ;;  %vm650_vm1 = vcmask 7168   ;;  %s745_s25 = sshll.u32 %s1633_s5, 4  ;;  %s746_s25 = int_to_ptr.hbm [resolvable:$true] %s745_s25 }
  0x22   :  { %88 = vperm.xlu0 %781, %v26_v22   ;;  %v30_v12 = vld [vmem:[%s1632_s4 + $0x8] sm:$0xff]  ;;  %v773_v56 = vld [vmem:[%s1630_s2 + $0x14] sm:$0xf]  ;;  %s825_s28 = smov [#allocation2]  }
  0x23   :  { %128 = vmatpush.bf16.msra.mxu0 %v65_v33  ;;  %v765_v33 = vld [vmem:[%s1630_s2 + $0x10] sm:$0xf] }
  0x24   :  { %147 = vmatpush.bf16.msra.mxu1 %v73_v32  ;;  %395 = vmatpush.bf16.msra.mxu2 %v372_v58  ;;  %v32_v32 = vld [vmem:[%s1632_s4 + $0x18] sm:$0xff] }
  0x25   :  { %414 = vmatpush.bf16.msra.mxu3 %v380_v10 }
  0x26   :  { %129 = vmatmul.bf16.vlgmr.msra.gmra.mxu0 %v758_v17 }
  0x27   :  { %148 = vmatmul.bf16.vlgmr.msra.gmra.mxu1 %v762_v16  ;;  %396 = vmatmul.bf16.vlgmr.msra.gmra.mxu2 %v758_v17 }
  0x28   :  { %415 = vmatmul.bf16.vlgmr.msra.gmra.mxu3 %v762_v16  ;;  %170 = vperm.xlu2 %783, %v30_v12   ;;  %v767_v12 = vld [vmem:[%s1630_s2 + $0x18] sm:$0xf0]  ;;  %v766_v16 = vor.u32 %v774_v43, %v765_v33 }
  0x29   :  { %180 = vperm.xlu1 %782, %v32_v32   ;;  %v770_v51 = vor.u32 %v773_v56, %v767_v12 }
  0x2a   :  { %175 = vperm.xlu0 %781, %v31_v55  }
  0x36   :  { %134 = vmatmul.bf16.gmra.mxu0 %v766_v16 }
  0x37   :  { %153 = vmatmul.bf16.gmra.mxu1 %v770_v51  ;;  %401 = vmatmul.bf16.gmra.mxu2 %v766_v16 }
  0x38   :  { %420 = vmatmul.bf16.gmra.mxu3 %v770_v51 }
  0x79   :  { %v166_v6 = vpop.permute.xlu2 %165 }
  0x82   :  { %v171_v41 = vpop.permute.xlu2 %170 }
  0x87   :  { %v84_v25 = vpop.permute.xlu0 %83 }
  0x8a   :  { %v94_v19 = vpop.permute.xlu1 %93 }
  0x93   :  { %v99_v31 = vpop.permute.xlu1 %98 }
  0x94   :  { %v89_v32 = vpop.permute.xlu0 %88 }
  0xa3   :  { %v130_v63 = vpop.f32.mrf.mxu0 }
  0xa4   :  { %v149_v58 = vpop.f32.mrf.mxu1  ;;  %v131_v47 = vadd.f32 %v130_v63, %v84_v25 }
  0xa6   :  { %v150_v33 = vadd.f32 %v149_v58, %v131_v47 }
  0xaa   :  { %v397_v22 = vpop.f32.mrf.mxu2 }
  0xab   :  { %v132_v10 = vpop.f32.mrf.mxu0  ;;  %v416_v17 = vpop.f32.mrf.mxu3  ;;  %v398_v18 = vadd.f32 %v397_v22, %v84_v25 }
  0xac   :  { %v151_v55 = vpop.f32.mrf.mxu1  ;;  %v133_v44 = vadd.f32 %v132_v10, %v89_v32 }
  0xad   :  { %v417_v42 = vadd.f32 %v416_v17, %v398_v18 }
  0xae   :  { %v152_v35 = vadd.f32 %v151_v55, %v133_v44 }
  0xb0   :  { %784 = vtanh.f32 %v152_v35 }
  0xb1   :  { %786 = vtanh.f32 %v150_v33 }
  0xb2   :  { %v399_v29 = vpop.f32.mrf.mxu2 }
  0xb3   :  { %v135_v43 = vpop.f32.mrf.mxu0  ;;  %v418_v56 = vpop.f32.mrf.mxu3  ;;  %v400_v51 = vadd.f32 %v399_v29, %v89_v32 }
  0xb4   :  { %v136_v12 = vadd.f32 %v135_v43, %v94_v19  ;;  %v154_v16 = vpop.f32.mrf.mxu1 }
  0xb5   :  { %v419_v54 = vadd.f32 %v418_v56, %v400_v51 }
  0xb6   :  { %v155_v5 = vadd.f32 %v154_v16, %v136_v12  ;;  %v785_v55 = vpop.eup %784 }
  0xb7   :  { %v787_v58 = vpop.eup %786  ;;  %v184_v25 = vmul.f32 %v785_v55, %v171_v41 }
  0xb8   :  { %788 = vtanh.f32 %v155_v5  ;;  %v176_v5 = vpop.permute.xlu0 %175  ;;  %v183_v22 = vmul.f32 %v787_v58, %v166_v6 }
  0xb9   :  { %790 = vtanh.f32 %v419_v54  ;;  %v189_v32 = vsel %vm187_vm0, %v184_v25, 0.0 }
  0xba   :  { %v402_v10 = vpop.f32.mrf.mxu2  ;;  %792 = vtanh.f32 %v417_v42  ;;  %v188_v12 = vsel %vm187_vm0, %v183_v22, 0.0 }
  0xbb   :  { %v403_v63 = vadd.f32 %v402_v10, %v94_v19  ;;  %v137_v7 = vpop.f32.mrf.mxu0  ;;  %v421_v44 = vpop.f32.mrf.mxu3  ;;  %v190_v10 = vadd.f32 %v189_v32, %v188_v12 }
  0xbc   :  { %v138_v47 = vadd.f32 %v137_v7, %v99_v31  ;;  %v156_v43 = vpop.f32.mrf.mxu1 }
  0xbd   :  { %v422_v53 = vadd.f32 %v421_v44, %v403_v63 }
  0xbe   :  { %v789_v29 = vpop.eup %788  ;;  %v157_v35 = vadd.f32 %v156_v43, %v138_v47 }
  0xbf   :  { %794 = vtanh.f32 %v422_v53  ;;  %v185_v18 = vmul.f32 %v789_v29, %v176_v5  ;;  %v791_v17 = vpop.eup %790  ;;  %v181_v53 = vpop.permute.xlu1 %180 }
  0xc0   :  { %796 = vtanh.f32 %v157_v35  ;;  %v793_v56 = vpop.eup %792  ;;  %v431_v63 = vmul.f32 %v791_v17, %v171_v41 }
  0xc1   :  { %v191_v42 = vsel %vm187_vm0, %v185_v18, 0.0  ;;  %v430_v55 = vmul.f32 %v793_v56, %v166_v6 }
  0xc2   :  { %v404_v19 = vpop.f32.mrf.mxu2  ;;  %v192_v47 = vadd.f32 %v191_v42, %v190_v10 }
  0xc3   :  { %v405_v33 = vadd.f32 %v404_v19, %v99_v31  ;;  %v423_v7 = vpop.f32.mrf.mxu3  ;;  %v435_v31 = vsel %vm187_vm0, %v431_v63, 0.0  ;;  %v434_v35 = vsel %vm187_vm0, %v430_v55, 0.0 }
  0xc4   :  { %v436_v19 = vadd.f32 %v435_v31, %v434_v35 }
  0xc5   :  { %v795_v54 = vpop.eup %794  ;;  %v424_v16 = vadd.f32 %v423_v7, %v405_v33 }
  0xc6   :  { %v797_v51 = vpop.eup %796  ;;  %v432_v58 = vmul.f32 %v795_v54, %v176_v5 }
  0xc7   :  { %v186_v44 = vmul.f32 %v797_v51, %v181_v53  ;;  %798 = vtanh.f32 %v424_v16 }
  0xc8   :  { %v437_v25 = vsel %vm187_vm0, %v432_v58, 0.0 }
  0xc9   :  { %v193_v43 = vsel %vm187_vm0, %v186_v44, 0.0  ;;  %v438_v41 = vadd.f32 %v437_v25, %v436_v19 }
  0xca   :  { %v194_v29 = vadd.f32 %v193_v43, %v192_v47 }
  0xcc   :  { %v195_v22 = vrot.slane %v194_v29, 4 }
  0xcd   :  { %v799_v18 = vpop.eup %798 }
  0xce   :  { %v433_v33 = vmul.f32 %v799_v18, %v181_v53  ;;  %v196_v32 = vadd.f32 %v195_v22, %v194_v29 }
  0xd0   :  { %v197_v17 = vrot.slane %v196_v32, 2  ;;  %v439_v6 = vsel %vm187_vm0, %v433_v33, 0.0 }
  0xd1   :  { %v440_v7 = vadd.f32 %v439_v6, %v438_v41 }
  0xd2   :  { %v198_v5 = vadd.f32 %v197_v17, %v196_v32 }
  0xd3   :  { %v441_v56 = vrot.slane %v440_v7, 4 }
  0xd4   :  { %v199_v54 = vrot.slane %v198_v5, 1 }
  0xd5   :  { %v442_v12 = vadd.f32 %v441_v56, %v440_v7 }
  0xd6   :  { %v200_v42 = vadd.f32 %v199_v54, %v198_v5 }
  0xd7   :  { %v443_v16 = vrot.slane %v442_v12, 2 }
  0xd8   :  { %v201_v51 = vsel %vm187_vm0, %v200_v42, -inf }
  0xd9   :  { %202 = vmax.xlane.f32.xlu2 %v201_v51  ;;  %v444_v10 = vadd.f32 %v443_v16, %v442_v12 }
  0xdb   :  { %v445_v63 = vrot.slane %v444_v10, 1 }
  0xdd   :  { %v446_v44 = vadd.f32 %v445_v63, %v444_v10 }
  0xdf   :  { %v447_v53 = vsel %vm187_vm0, %v446_v44, -inf }
  0xe0   :  { %448 = vmax.xlane.f32.xlu0 %v447_v53 }
 0x14c   :  { %v203_v55 = vpop.xlane.xlu2 %202 }
 0x14d   :  { %v204_v47 = vsub.f32 %v200_v42, %v203_v55 }
 0x14f   :  { %v205_v58 = vmul.f32 1.442695, %v204_v47 }
 0x151   :  { %800 = vpow2.f32 %v205_v58 }
 0x153   :  { %v449_v43 = vpop.xlane.xlu0 %448 }
 0x154   :  { %v450_v31 = vsub.f32 %v446_v44, %v449_v43 }
 0x156   :  { %v451_v29 = vmul.f32 1.442695, %v450_v31 }
 0x157   :  { %v801_v35 = vpop.eup %800 }
 0x158   :  { %802 = vpow2.f32 %v451_v29  ;;  %v207_v25 = vsel %vm187_vm0, %v801_v35, 0.0 }
 0x159   :  { %208 = vadd.xlane.f32.xlu1 %v207_v25 }
 0x15e   :  { %v1299_v22 = vpop.eup %802 }
 0x15f   :  { %v453_v18 = vsel %vm187_vm0, %v1299_v22, 0.0 }
 0x160   :  { %454 = vadd.xlane.f32.xlu2 %v453_v18 }
 0x1cc   :  { %v209_v19 = vpop.xlane.xlu1 %208 }
 0x1cd   :  { %804 = vrcp.f32 %v209_v19 }
 0x1d3   :  { %v805_v33 = vpop.eup %804  ;;  %v455_v19 = vpop.xlane.xlu2 %454 }
 0x1d4   :  { %v1303_v32 = vmul.f32 %v805_v33, %v801_v35  ;;  %806 = vrcp.f32 %v455_v19 }
 0x1d6   :  { %v216_v41 = vmul.f32 %v1303_v32, %v1097_v60  ;;  %v213_v17 = vmul.f32 %v1303_v32, %v1204_v20  ;;  %v212_v6 = vmul.f32 %v1303_v32, %v1192_v59  ;;  %v219_v54 = vmul.f32 %v1303_v32, %v1054_v49 }
 0x1d7   :  { %v214_v60 = vmul.f32 %v1303_v32, %v1145_v26  ;;  %v215_v20 = vmul.f32 %v1303_v32, %v1150_v30  ;;  %v222_v16 = vmul.f32 %v1303_v32, %v953_v23  ;;  %v217_v49 = vmul.f32 %v1303_v32, %v1102_v61 }
 0x1d8   :  { %v256_v7 = vsel %vm187_vm0, %v216_v41, 0.0  ;;  %v247_v5 = vsel %vm187_vm0, %v213_v17, 0.0  ;;  %v244_v56 = vsel %vm187_vm0, %v212_v6, 0.0  ;;  %v265_v59 = vsel %vm187_vm0, %v219_v54, 0.0 }
 0x1d9   :  { %257 = vadd.xlane.f32.xlu1 %v256_v7  ;;  %248 = vadd.xlane.f32.xlu0 %v247_v5  ;;  %v250_v12 = vsel %vm187_vm0, %v214_v60, 0.0  ;;  %v253_v42 = vsel %vm187_vm0, %v215_v20, 0.0  ;;  %v218_v26 = vmul.f32 %v1303_v32, %v1049_v48  ;;  %v274_v30 = vsel %vm187_vm0, %v222_v16, 0.0 }
 0x1da   :  { %245 = vadd.xlane.f32.xlu2 %v244_v56  ;;  %v259_v51 = vsel %vm187_vm0, %v217_v49, 0.0  ;;  %v225_v63 = vmul.f32 %v1303_v32, %v912_v13  ;;  %v220_v23 = vmul.f32 %v1303_v32, %v1001_v36  ;;  %v221_v61 = vmul.f32 %v1303_v32, %v1006_v37 }
 0x1db   :  { %v262_v10 = vsel %vm187_vm0, %v218_v26, 0.0  ;;  %v228_v55 = vmul.f32 %v1303_v32, %v1209_v57  ;;  %v223_v13 = vmul.f32 %v1303_v32, %v958_v24  ;;  %v224_v36 = vmul.f32 %v1303_v32, %v905_v11 }
 0x1dc   :  { %v283_v48 = vsel %vm187_vm0, %v225_v63, 0.0  ;;  %v268_v44 = vsel %vm187_vm0, %v220_v23, 0.0  ;;  %v271_v53 = vsel %vm187_vm0, %v221_v61, 0.0  ;;  %v226_v43 = vmul.f32 %v1303_v32, %v859_v0  ;;  %v1692_v63 = vld [vmem:[#allocation26_spill] sm:$0xff] }
 0x1dd   :  { %v292_v37 = vsel %vm187_vm0, %v228_v55, 0.0  ;;  %v277_v47 = vsel %vm187_vm0, %v223_v13, 0.0  ;;  %v280_v58 = vsel %vm187_vm0, %v224_v36, 0.0  ;;  %v231_v57 = vmul.f32 %v1303_v32, %v1162_v39  ;;  %v1695_v13 = vld [vmem:[#allocation23_spill] sm:$0xff] }
 0x1de   :  { %v227_v24 = vmul.f32 %v1303_v32, %v864_v1  ;;  %v286_v31 = vsel %vm187_vm0, %v226_v43, 0.0  ;;  %v234_v35 = vmul.f32 %v1303_v32, %v1059_v50  ;;  %v229_v0 = vmul.f32 %v1303_v32, %v1214_v21  ;;  %v1696_v43 = vld [vmem:[#allocation6_spill] sm:$0xff] }
 0x1df   :  { %v301_v11 = vsel %vm187_vm0, %v231_v57, 0.0  ;;  %v230_v39 = vmul.f32 %v1303_v32, %v1155_v34  ;;  %v237_v33 = vmul.f32 %v1303_v32, %v1018_v40  ;;  %v232_v50 = vmul.f32 %v1303_v32, %v1107_v62  ;;  %v807_v62 = vpop.eup %806 }
 0x1e0   :  { %v289_v29 = vsel %vm187_vm0, %v227_v24, 0.0  ;;  %v310_v1 = vsel %vm187_vm0, %v234_v35, 0.0  ;;  %v295_v25 = vsel %vm187_vm0, %v229_v0, 0.0  ;;  %v233_v21 = vmul.f32 %v1303_v32, %v1114_v3  ;;  %v1697_v24 = vld [vmem:[#allocation10_spill] sm:$0xff] }
 0x1e1   :  { %266 = vadd.xlane.f32.xlu1 %v265_v59  ;;  %251 = vadd.xlane.f32.xlu0 %v250_v12  ;;  %v298_v18 = vsel %vm187_vm0, %v230_v39, 0.0  ;;  %v319_v34 = vsel %vm187_vm0, %v237_v33, 0.0  ;;  %v304_v41 = vsel %vm187_vm0, %v232_v50, 0.0  ;;  %v240_v6 = vmul.f32 %v1303_v32, %v917_v14  ;;  %v1700_v33 = vld [vmem:[#allocation32_spill] sm:$0xff] }
 0x1e2   :  { %254 = vadd.xlane.f32.xlu2 %v253_v42  ;;  %v307_v17 = vsel %vm187_vm0, %v233_v21, 0.0  ;;  %v235_v40 = vmul.f32 %v1303_v32, %v1066_v52  ;;  %v236_v3 = vmul.f32 %v1303_v32, %v1011_v38  ;;  %v1384_v7 = vmul.f32 %v807_v62, %v1299_v22 }
 0x1e3   :  { %v328_v5 = vsel %vm187_vm0, %v240_v6, 0.0  ;;  %v238_v14 = vmul.f32 %v1303_v32, %v965_v27  ;;  %v239_v38 = vmul.f32 %v1303_v32, %v970_v28  ;;  %v241_v59 = vmul.f32 %v1303_v32, %v922_v15 }
 0x1e4   :  { %v313_v56 = vsel %vm187_vm0, %v235_v40, 0.0  ;;  %v316_v54 = vsel %vm187_vm0, %v236_v3, 0.0  ;;  %v458_v52 = vmul.f32 %v1384_v7, %v1221_v9  ;;  %v460_v27 = vmul.f32 %v1384_v7, %v1167_v45 }
 0x1e5   :  { %v322_v22 = vsel %vm187_vm0, %v238_v14, 0.0  ;;  %v325_v20 = vsel %vm187_vm0, %v239_v38, 0.0  ;;  %v242_v9 = vmul.f32 %v1303_v32, %v869_v2  ;;  %v331_v28 = vsel %vm187_vm0, %v241_v59, 0.0  ;;  %v1704_v38 = vld [vmem:[#allocation31_spill] sm:$0xff] }
 0x1e6   :  { %v490_v60 = vsel %vm187_vm0, %v458_v52, 0.0  ;;  %v496_v12 = vsel %vm187_vm0, %v460_v27, 0.0  ;;  %v461_v16 = vmul.f32 %v1384_v7, %v1172_v46  ;;  %v463_v15 = vmul.f32 %v1384_v7, %v1124_v8 }
 0x1e7   :  { %v334_v42 = vsel %vm187_vm0, %v242_v9, 0.0  ;;  %v459_v45 = vmul.f32 %v1384_v7, %v1226_v4  ;;  %v462_v8 = vmul.f32 %v1384_v7, %v1692_v63  ;;  %v465_v36 = vmul.f32 %v1384_v7, %v1695_v13 }
 0x1e8   :  { %v499_v2 = vsel %vm187_vm0, %v461_v16, 0.0  ;;  %v505_v49 = vsel %vm187_vm0, %v463_v15, 0.0  ;;  %v472_v57 = vmul.f32 %v1384_v7, %v1696_v43  ;;  %v475_v50 = vmul.f32 %v1384_v7, %v1700_v33 }
 0x1e9   :  { %275 = vadd.xlane.f32.xlu1 %v274_v30  ;;  %260 = vadd.xlane.f32.xlu0 %v259_v51  ;;  %v493_v26 = vsel %vm187_vm0, %v459_v45, 0.0  ;;  %v1690_v30 = vld [vmem:[#allocation22_spill] sm:$0xff]  ;;  %v502_v61 = vsel %vm187_vm0, %v462_v8, 0.0  ;;  %v1709_v8 = vld [vmem:[#allocation16_spill] sm:$0xff] }
 0x1ea   :  { %263 = vadd.xlane.f32.xlu2 %v262_v10  ;;  %v464_v51 = vmul.f32 %v1384_v7, %v1690_v30  ;;  %v1691_v10 = vld [vmem:[#allocation18_spill] sm:$0xff]  ;;  %v532_v0 = vsel %vm187_vm0, %v472_v57, 0.0  ;;  %v541_v6 = vsel %vm187_vm0, %v475_v50, 0.0 }
 0x1eb   :  { %v466_v46 = vmul.f32 %v1384_v7, %v1691_v10  ;;  %v1707_v45 = vld [vmem:[#allocation30_spill] sm:$0xff] }
 0x1ec   :  { %v508_v4 = vsel %vm187_vm0, %v464_v51, 0.0 }
 0x1ed   :  { %v514_v23 = vsel %vm187_vm0, %v466_v46, 0.0  ;;  %v1708_v46 = vld [vmem:[#allocation20_spill] sm:$0xff] }
 0x1ee   :  { %v482_v63 = vmul.f32 %v1384_v7, %v1708_v46 }
 0x1f1   :  { %284 = vadd.xlane.f32.xlu1 %v283_v48  ;;  %269 = vadd.xlane.f32.xlu0 %v268_v44  ;;  %v1693_v48 = vld [vmem:[#allocation19_spill] sm:$0xff] }
 0x1f2   :  { %272 = vadd.xlane.f32.xlu2 %v271_v53  ;;  %v467_v44 = vmul.f32 %v1384_v7, %v1693_v48  ;;  %v1694_v53 = vld [vmem:[#allocation15_spill] sm:$0xff] }
 0x1f3   :  { %v469_v55 = vmul.f32 %v1384_v7, %v1694_v53 }
 0x1f9   :  { %293 = vadd.xlane.f32.xlu1 %v292_v37  ;;  %278 = vadd.xlane.f32.xlu0 %v277_v47  ;;  %v517_v37 = vsel %vm187_vm0, %v467_v44, 0.0  ;;  %v523_v47 = vsel %vm187_vm0, %v469_v55, 0.0  ;;  %v562_v44 = vsel %vm187_vm0, %v482_v63, 0.0 }
 0x1fa   :  { %281 = vadd.xlane.f32.xlu2 %v280_v58  ;;  %v511_v58 = vsel %vm187_vm0, %v465_v36, 0.0 }
 0x201   :  { %302 = vadd.xlane.f32.xlu1 %v301_v11  ;;  %287 = vadd.xlane.f32.xlu0 %v286_v31  ;;  %v470_v11 = vmul.f32 %v1384_v7, %v1697_v24  ;;  %v1698_v31 = vld [vmem:[#allocation14_spill] sm:$0xff]  ;;  %v1713_v24 = vld [vmem:[#allocation21_spill] sm:$0xff] }
 0x202   :  { %290 = vadd.xlane.f32.xlu2 %v289_v29  ;;  %v468_v29 = vmul.f32 %v1384_v7, %v1698_v31 }
 0x203   :  { %v526_v35 = vsel %vm187_vm0, %v470_v11, 0.0  ;;  %v483_v11 = vmul.f32 %v1384_v7, %v1713_v24 }
 0x204   :  { %v520_v39 = vsel %vm187_vm0, %v468_v29, 0.0 }
 0x209   :  { %311 = vadd.xlane.f32.xlu1 %v310_v1  ;;  %296 = vadd.xlane.f32.xlu0 %v295_v25  ;;  %v1699_v1 = vld [vmem:[#allocation7_spill] sm:$0xff] }
 0x20a   :  { %299 = vadd.xlane.f32.xlu2 %v298_v18  ;;  %v473_v25 = vmul.f32 %v1384_v7, %v1699_v1  ;;  %v1715_v1 = vld [vmem:[#allocation8_spill] sm:$0xff] }
 0x211   :  { %320 = vadd.xlane.f32.xlu1 %v319_v34  ;;  %305 = vadd.xlane.f32.xlu0 %v304_v41  ;;  %v1701_v34 = vld [vmem:[#allocation11_spill] sm:$0xff] }
 0x212   :  { %308 = vadd.xlane.f32.xlu2 %v307_v17  ;;  %v471_v41 = vmul.f32 %v1384_v7, %v1701_v34  ;;  %v535_v17 = vsel %vm187_vm0, %v473_v25, 0.0  ;;  %v488_v25 = vmul.f32 %v1384_v7, %v1715_v1 }
 0x214   :  { %v529_v40 = vsel %vm187_vm0, %v471_v41, 0.0  ;;  %v1716_v41 = vld [vmem:[#allocation12_spill] sm:$0xff] }
 0x219   :  { %329 = vadd.xlane.f32.xlu1 %v328_v5  ;;  %314 = vadd.xlane.f32.xlu0 %v313_v56  ;;  %v1702_v5 = vld [vmem:[#allocation29_spill] sm:$0xff] }
 0x21a   :  { %317 = vadd.xlane.f32.xlu2 %v316_v54  ;;  %v476_v56 = vmul.f32 %v1384_v7, %v1702_v5  ;;  %v1703_v54 = vld [vmem:[#allocation27_spill] sm:$0xff] }
 0x21b   :  { %v478_v14 = vmul.f32 %v1384_v7, %v1703_v54  ;;  %v1717_v54 = vld [vmem:[#allocation9_spill] sm:$0xff] }
 0x221   :  { %323 = vadd.xlane.f32.xlu0 %v322_v22  ;;  %491 = vadd.xlane.f32.xlu1 %v490_v60  ;;  %v474_v22 = vmul.f32 %v1384_v7, %v1704_v38  ;;  %v544_v60 = vsel %vm187_vm0, %v476_v56, 0.0 }
 0x222   :  { %326 = vadd.xlane.f32.xlu2 %v325_v20  ;;  %v550_v20 = vsel %vm187_vm0, %v478_v14, 0.0  ;;  %v489_v14 = vmul.f32 %v1384_v7, %v1717_v54 }
 0x223   :  { %v538_v59 = vsel %vm187_vm0, %v474_v22, 0.0 }
 0x224   :  { %v583_v22 = vsel %vm187_vm0, %v489_v14, 0.0 }
 0x229   :  { %332 = vadd.xlane.f32.xlu0 %v331_v28  ;;  %497 = vadd.xlane.f32.xlu1 %v496_v12  ;;  %v1705_v28 = vld [vmem:[#allocation28_spill] sm:$0xff] }
 0x22a   :  { %335 = vadd.xlane.f32.xlu2 %v334_v42  ;;  %v479_v12 = vmul.f32 %v1384_v7, %v1705_v28  ;;  %v1706_v42 = vld [vmem:[#allocation25_spill] sm:$0xff] }
 0x22b   :  { %v481_v16 = vmul.f32 %v1384_v7, %v1706_v42 }
 0x231   :  { %500 = vadd.xlane.f32.xlu0 %v499_v2  ;;  %506 = vadd.xlane.f32.xlu1 %v505_v49  ;;  %v477_v2 = vmul.f32 %v1384_v7, %v1707_v45  ;;  %v553_v49 = vsel %vm187_vm0, %v479_v12, 0.0 }
 0x232   :  { %494 = vadd.xlane.f32.xlu2 %v493_v26  ;;  %v559_v26 = vsel %vm187_vm0, %v481_v16, 0.0 }
 0x233   :  { %v547_v30 = vsel %vm187_vm0, %v477_v2, 0.0 }
 0x239   :  { %509 = vadd.xlane.f32.xlu0 %v508_v4  ;;  %515 = vadd.xlane.f32.xlu1 %v514_v23  ;;  %v484_v4 = vmul.f32 %v1384_v7, %v1709_v8 }
 0x23a   :  { %503 = vadd.xlane.f32.xlu2 %v502_v61  ;;  %v1710_v61 = vld [vmem:[#allocation24_spill] sm:$0xff] }
 0x23b   :  { %v480_v48 = vmul.f32 %v1384_v7, %v1710_v61  ;;  %v568_v53 = vsel %vm187_vm0, %v484_v4, 0.0 }
 0x23d   :  { %v556_v55 = vsel %vm187_vm0, %v480_v48, 0.0 }
 0x241   :  { %518 = vadd.xlane.f32.xlu0 %v517_v37  ;;  %524 = vadd.xlane.f32.xlu1 %v523_v47  ;;  %v1711_v37 = vld [vmem:[#allocation17_spill] sm:$0xff] }
 0x242   :  { %512 = vadd.xlane.f32.xlu2 %v511_v58  ;;  %v485_v47 = vmul.f32 %v1384_v7, %v1711_v37  ;;  %v1712_v58 = vld [vmem:[#allocation13_spill] sm:$0xff] }
 0x243   :  { %v487_v43 = vmul.f32 %v1384_v7, %v1712_v58 }
 0x244   :  { %v571_v31 = vsel %vm187_vm0, %v485_v47, 0.0 }
 0x245   :  { %v577_v29 = vsel %vm187_vm0, %v487_v43, 0.0 }
 0x249   :  { %527 = vadd.xlane.f32.xlu0 %v526_v35  ;;  %533 = vadd.xlane.f32.xlu1 %v532_v0  ;;  %v565_v35 = vsel %vm187_vm0, %v483_v11, 0.0  ;;  %v1714_v0 = vld [vmem:[#allocation5_spill] sm:$0xff] }
 0x24a   :  { %521 = vadd.xlane.f32.xlu2 %v520_v39  ;;  %v243_v39 = vmul.f32 %v1303_v32, %v1714_v0 }
 0x24c   :  { %v1445_v18 = vpop.xlane.xlu1 %257  ;;  %v1447_v19 = vpop.xlane.xlu0 %248 }
 0x24d   :  { %v1451_v21 = vpop.xlane.xlu2 %245 }
 0x251   :  { %536 = vadd.xlane.f32.xlu0 %v535_v17  ;;  %542 = vadd.xlane.f32.xlu1 %v541_v6  ;;  %v486_v17 = vmul.f32 %v1384_v7, %v1716_v41  ;;  %v580_v6 = vsel %vm187_vm0, %v488_v25, 0.0 }
 0x252   :  { %530 = vadd.xlane.f32.xlu2 %v529_v40  ;;  %v337_v40 = vsel %vm187_vm0, %v243_v39, 0.0 }
 0x253   :  { %v574_v5 = vsel %vm187_vm0, %v486_v17, 0.0 }
 0x254   :  { %v1458_v62 = vpop.xlane.xlu1 %266  ;;  %v1460_v3 = vpop.xlane.xlu0 %251 }
 0x255   :  { %v1466_v52 = vpop.xlane.xlu2 %254 }
 0x259   :  { %545 = vadd.xlane.f32.xlu0 %v544_v60  ;;  %551 = vadd.xlane.f32.xlu1 %v550_v20 }
 0x25a   :  { %539 = vadd.xlane.f32.xlu2 %v538_v59 }
 0x25c   :  { %v1473_v27 = vpop.xlane.xlu1 %275  ;;  %v1475_v9 = vpop.xlane.xlu0 %260 }
 0x25d   :  { %v1481_v15 = vpop.xlane.xlu2 %263 }
 0x261   :  { %554 = vadd.xlane.f32.xlu0 %v553_v49  ;;  %560 = vadd.xlane.f32.xlu1 %v559_v26 }
 0x262   :  { %548 = vadd.xlane.f32.xlu2 %v547_v30 }
 0x264   :  { %v1488_v51 = vpop.xlane.xlu1 %284  ;;  %v1490_v10 = vpop.xlane.xlu0 %269 }
 0x265   :  { %v1496_v23 = vpop.xlane.xlu2 %272 }
 0x269   :  { %563 = vadd.xlane.f32.xlu0 %v562_v44  ;;  %569 = vadd.xlane.f32.xlu1 %v568_v53 }
 0x26a   :  { %557 = vadd.xlane.f32.xlu2 %v556_v55 }
 0x26c   :  { %v1503_v13 = vpop.xlane.xlu1 %293  ;;  %v1505_v36 = vpop.xlane.xlu0 %278 }
 0x26d   :  { %v1511_v57 = vpop.xlane.xlu2 %281 }
 0x271   :  { %572 = vadd.xlane.f32.xlu0 %v571_v31  ;;  %578 = vadd.xlane.f32.xlu1 %v577_v29 }
 0x272   :  { %566 = vadd.xlane.f32.xlu2 %v565_v35 }
 0x274   :  { %v1522_v33 = vpop.xlane.xlu1 %302  ;;  %v1524_v50 = vpop.xlane.xlu0 %287 }
 0x275   :  { %v1526_v34 = vpop.xlane.xlu2 %290 }
 0x279   :  { %581 = vadd.xlane.f32.xlu0 %v580_v6  ;;  %338 = vadd.xlane.f32.xlu1 %v337_v40 }
 0x27a   :  { %575 = vadd.xlane.f32.xlu2 %v574_v5 }
 0x27c   :  { %v1533_v32 = vpop.xlane.xlu1 %311  ;;  %v1535_v56 = vpop.xlane.xlu0 %296 }
 0x27d   :  { %v1539_v38 = vpop.xlane.xlu2 %299 }
 0x282   :  { %584 = vadd.xlane.f32.xlu2 %v583_v22 }
 0x284   :  { %v1542_v60 = vpop.xlane.xlu1 %320  ;;  %v1544_v20 = vpop.xlane.xlu0 %305 }
 0x285   :  { %v1546_v59 = vpop.xlane.xlu2 %308 }
 0x28c   :  { %v1548_v28 = vpop.xlane.xlu1 %329  ;;  %v1550_v12 = vpop.xlane.xlu0 %314 }
 0x28d   :  { %v1552_v42 = vpop.xlane.xlu2 %317 }
 0x294   :  { %v1554_v16 = vpop.xlane.xlu0 %323  ;;  %v492_v7 = vpop.xlane.xlu1 %491 }
 0x295   :  { %v1556_v45 = vpop.xlane.xlu2 %326  ;;  %v586_v30 = vsub.f32 %v1451_v21, %v492_v7 }
 0x297   :  { %v618_v61 = vmul.f32 %v586_v30, %v586_v30 }
 0x299   :  { %v651_v37 = vsel %vm650_vm1, %v618_v61, 0.0 }
 0x29c   :  { %v1558_v2 = vpop.xlane.xlu0 %332  ;;  %v498_v49 = vpop.xlane.xlu1 %497 }
 0x29d   :  { %v1560_v26 = vpop.xlane.xlu2 %335  ;;  %v588_v46 = vsub.f32 %v1460_v3, %v498_v49 }
 0x29f   :  { %v620_v44 = vmul.f32 %v588_v46, %v588_v46 }
 0x2a1   :  { %v654_v21 = vsel %vm650_vm1, %v620_v44, 0.0 }
 0x2a4   :  { %v501_v63 = vpop.xlane.xlu0 %500  ;;  %v507_v8 = vpop.xlane.xlu1 %506 }
 0x2a5   :  { %v495_v4 = vpop.xlane.xlu2 %494  ;;  %v589_v53 = vsub.f32 %v1466_v52, %v501_v63  ;;  %v591_v3 = vsub.f32 %v1475_v9, %v507_v8 }
 0x2a6   :  { %v587_v48 = vsub.f32 %v1447_v19, %v495_v4 }
 0x2a7   :  { %v621_v43 = vmul.f32 %v589_v53, %v589_v53  ;;  %v623_v52 = vmul.f32 %v591_v3, %v591_v3 }
 0x2a8   :  { %v619_v55 = vmul.f32 %v587_v48, %v587_v48 }
 0x2a9   :  { %v656_v35 = vsel %vm650_vm1, %v621_v43, 0.0  ;;  %v660_v17 = vsel %vm650_vm1, %v623_v52, 0.0 }
 0x2aa   :  { %v652_v47 = vsel %vm650_vm1, %v619_v55, 0.0 }
 0x2ab   :  { %v653_v58 = vadd.f32 %v652_v47, %v651_v37 }
 0x2ac   :  { %v510_v24 = vpop.xlane.xlu0 %509  ;;  %v516_v11 = vpop.xlane.xlu1 %515 }
 0x2ad   :  { %v655_v31 = vadd.f32 %v654_v21, %v653_v58  ;;  %v504_v29 = vpop.xlane.xlu2 %503  ;;  %v592_v0 = vsub.f32 %v1481_v15, %v510_v24  ;;  %v594_v9 = vsub.f32 %v1490_v10, %v516_v11 }
 0x2ae   :  { %v590_v19 = vsub.f32 %v1445_v18, %v504_v29 }
 0x2af   :  { %v657_v1 = vadd.f32 %v656_v35, %v655_v31  ;;  %v624_v6 = vmul.f32 %v592_v0, %v592_v0  ;;  %v626_v7 = vmul.f32 %v594_v9, %v594_v9 }
 0x2b0   :  { %v622_v39 = vmul.f32 %v590_v19, %v590_v19 }
 0x2b1   :  { %v662_v22 = vsel %vm650_vm1, %v624_v6, 0.0  ;;  %v666_v8 = vsel %vm650_vm1, %v626_v7, 0.0 }
 0x2b2   :  { %v658_v25 = vsel %vm650_vm1, %v622_v39, 0.0 }
 0x2b3   :  { %v659_v41 = vadd.f32 %v658_v25, %v657_v1 }
 0x2b4   :  { %v519_v40 = vpop.xlane.xlu0 %518  ;;  %v525_v5 = vpop.xlane.xlu1 %524 }
 0x2b5   :  { %v661_v54 = vadd.f32 %v660_v17, %v659_v41  ;;  %v513_v14 = vpop.xlane.xlu2 %512  ;;  %v595_v15 = vsub.f32 %v1496_v23, %v519_v40  ;;  %v597_v10 = vsub.f32 %v1505_v36, %v525_v5 }
 0x2b6   :  { %v593_v18 = vsub.f32 %v1458_v62, %v513_v14 }
 0x2b7   :  { %v663_v30 = vadd.f32 %v662_v22, %v661_v54  ;;  %v627_v4 = vmul.f32 %v595_v15, %v595_v15  ;;  %v629_v37 = vmul.f32 %v597_v10, %v597_v10 }
 0x2b8   :  { %v625_v49 = vmul.f32 %v593_v18, %v593_v18 }
 0x2b9   :  { %v668_v55 = vsel %vm650_vm1, %v627_v4, 0.0  ;;  %v672_v3 = vsel %vm650_vm1, %v629_v37, 0.0 }
 0x2ba   :  { %v664_v46 = vsel %vm650_vm1, %v625_v49, 0.0 }
 0x2bb   :  { %v665_v63 = vadd.f32 %v664_v46, %v663_v30 }
 0x2bc   :  { %v528_v61 = vpop.xlane.xlu0 %527  ;;  %v534_v48 = vpop.xlane.xlu1 %533 }
 0x2bd   :  { %v667_v44 = vadd.f32 %v666_v8, %v665_v63  ;;  %v522_v53 = vpop.xlane.xlu2 %521  ;;  %v598_v23 = vsub.f32 %v1511_v57, %v528_v61  ;;  %v600_v36 = vsub.f32 %v1524_v50, %v534_v48 }
 0x2be   :  { %v596_v62 = vsub.f32 %v1473_v27, %v522_v53 }
 0x2bf   :  { %v669_v58 = vadd.f32 %v668_v55, %v667_v44  ;;  %v630_v24 = vmul.f32 %v598_v23, %v598_v23  ;;  %v632_v52 = vmul.f32 %v600_v36, %v600_v36 }
 0x2c0   :  { %v628_v47 = vmul.f32 %v596_v62, %v596_v62 }
 0x2c1   :  { %v674_v35 = vsel %vm650_vm1, %v630_v24, 0.0  ;;  %v678_v41 = vsel %vm650_vm1, %v632_v52, 0.0 }
 0x2c2   :  { %v670_v21 = vsel %vm650_vm1, %v628_v47, 0.0 }
 0x2c3   :  { %v671_v43 = vadd.f32 %v670_v21, %v669_v58 }
 0x2c4   :  { %v537_v11 = vpop.xlane.xlu0 %536  ;;  %v543_v31 = vpop.xlane.xlu1 %542 }
 0x2c5   :  { %v673_v29 = vadd.f32 %v672_v3, %v671_v43  ;;  %v531_v19 = vpop.xlane.xlu2 %530  ;;  %v601_v57 = vsub.f32 %v1526_v34, %v537_v11  ;;  %v603_v50 = vsub.f32 %v1535_v56, %v543_v31 }
 0x2c6   :  { %v599_v27 = vsub.f32 %v1488_v51, %v531_v19 }
 0x2c7   :  { %v675_v39 = vadd.f32 %v674_v35, %v673_v29  ;;  %v633_v17 = vmul.f32 %v601_v57, %v601_v57  ;;  %v635_v14 = vmul.f32 %v603_v50, %v603_v50 }
 0x2c8   :  { %v631_v0 = vmul.f32 %v599_v27, %v599_v27 }
 0x2c9   :  { %v680_v54 = vsel %vm650_vm1, %v633_v17, 0.0  ;;  %v684_v49 = vsel %vm650_vm1, %v635_v14, 0.0 }
 0x2ca   :  { %v676_v1 = vsel %vm650_vm1, %v631_v0, 0.0 }
 0x2cb   :  { %v677_v25 = vadd.f32 %v676_v1, %v675_v39 }
 0x2cc   :  { %v546_v6 = vpop.xlane.xlu0 %545  ;;  %v552_v9 = vpop.xlane.xlu1 %551 }
 0x2cd   :  { %v679_v40 = vadd.f32 %v678_v41, %v677_v25  ;;  %v540_v5 = vpop.xlane.xlu2 %539  ;;  %v604_v34 = vsub.f32 %v1539_v38, %v546_v6  ;;  %v606_v56 = vsub.f32 %v1544_v20, %v552_v9 }
 0x2ce   :  { %v602_v51 = vsub.f32 %v1503_v13, %v540_v5 }
 0x2cf   :  { %v681_v22 = vadd.f32 %v680_v54, %v679_v40  ;;  %v636_v30 = vmul.f32 %v604_v34, %v604_v34  ;;  %v638_v61 = vmul.f32 %v606_v56, %v606_v56 }
 0x2d0   :  { %v634_v18 = vmul.f32 %v602_v51, %v602_v51 }
 0x2d1   :  { %v686_v10 = vsel %vm650_vm1, %v636_v30, 0.0  ;;  %v690_v55 = vsel %vm650_vm1, %v638_v61, 0.0 }
 0x2d2   :  { %v682_v7 = vsel %vm650_vm1, %v634_v18, 0.0 }
 0x2d3   :  { %v683_v15 = vadd.f32 %v682_v7, %v681_v22 }
 0x2d4   :  { %v555_v46 = vpop.xlane.xlu0 %554  ;;  %v561_v8 = vpop.xlane.xlu1 %560 }
 0x2d5   :  { %v685_v63 = vadd.f32 %v684_v49, %v683_v15  ;;  %v549_v4 = vpop.xlane.xlu2 %548  ;;  %v607_v38 = vsub.f32 %v1546_v59, %v555_v46  ;;  %v609_v20 = vsub.f32 %v1550_v12, %v561_v8 }
 0x2d6   :  { %v605_v13 = vsub.f32 %v1522_v33, %v549_v4 }
 0x2d7   :  { %v687_v44 = vadd.f32 %v686_v10, %v685_v63  ;;  %v639_v37 = vmul.f32 %v607_v38, %v607_v38  ;;  %v641_v3 = vmul.f32 %v609_v20, %v609_v20 }
 0x2d8   :  { %v637_v48 = vmul.f32 %v605_v13, %v605_v13 }
 0x2d9   :  { %v692_v43 = vsel %vm650_vm1, %v639_v37, 0.0  ;;  %v696_v29 = vsel %vm650_vm1, %v641_v3, 0.0 }
 0x2da   :  { %v688_v53 = vsel %vm650_vm1, %v637_v48, 0.0 }
 0x2db   :  { %v689_v62 = vadd.f32 %v688_v53, %v687_v44 }
 0x2dc   :  { %v564_v23 = vpop.xlane.xlu0 %563  ;;  %v570_v21 = vpop.xlane.xlu1 %569 }
 0x2dd   :  { %v691_v47 = vadd.f32 %v690_v55, %v689_v62  ;;  %v558_v58 = vpop.xlane.xlu2 %557  ;;  %v610_v59 = vsub.f32 %v1552_v42, %v564_v23  ;;  %v612_v12 = vsub.f32 %v1554_v16, %v570_v21 }
 0x2de   :  { %v608_v33 = vsub.f32 %v1533_v32, %v558_v58 }
 0x2df   :  { %v693_v36 = vadd.f32 %v692_v43, %v691_v47  ;;  %v642_v19 = vmul.f32 %v610_v59, %v610_v59  ;;  %v644_v0 = vmul.f32 %v612_v12, %v612_v12 }
 0x2e0   :  { %v640_v24 = vmul.f32 %v608_v33, %v608_v33 }
 0x2e1   :  { %v698_v57 = vsel %vm650_vm1, %v642_v19, 0.0  ;;  %v702_v50 = vsel %vm650_vm1, %v644_v0, 0.0 }
 0x2e2   :  { %v694_v11 = vsel %vm650_vm1, %v640_v24, 0.0 }
 0x2e3   :  { %v695_v31 = vadd.f32 %v694_v11, %v693_v36 }
 0x2e4   :  { %v573_v27 = vpop.xlane.xlu0 %572  ;;  %v579_v1 = vpop.xlane.xlu1 %578 }
 0x2e5   :  { %v697_v35 = vadd.f32 %v696_v29, %v695_v31  ;;  %v567_v52 = vpop.xlane.xlu2 %566  ;;  %v613_v42 = vsub.f32 %v1556_v45, %v573_v27  ;;  %v615_v16 = vsub.f32 %v1558_v2, %v579_v1 }
 0x2e6   :  { %v611_v32 = vsub.f32 %v1542_v60, %v567_v52 }
 0x2e7   :  { %v699_v25 = vadd.f32 %v698_v57, %v697_v35  ;;  %v645_v6 = vmul.f32 %v613_v42, %v613_v42  ;;  %v647_v54 = vmul.f32 %v615_v16, %v615_v16 }
 0x2e8   :  { %v643_v39 = vmul.f32 %v611_v32, %v611_v32 }
 0x2e9   :  { %v704_v51 = vsel %vm650_vm1, %v645_v6, 0.0  ;;  %v708_v7 = vsel %vm650_vm1, %v647_v54, 0.0 }
 0x2ea   :  { %v700_v41 = vsel %vm650_vm1, %v643_v39, 0.0 }
 0x2eb   :  { %v701_v17 = vadd.f32 %v700_v41, %v699_v25 }
 0x2ec   :  { %v582_v40 = vpop.xlane.xlu0 %581  ;;  %v339_v49 = vpop.xlane.xlu1 %338 }
 0x2ed   :  { %v703_v9 = vadd.f32 %v702_v50, %v701_v17  ;;  %v576_v5 = vpop.xlane.xlu2 %575  ;;  %v616_v45 = vsub.f32 %v1560_v26, %v582_v40 }
 0x2ee   :  { %v614_v60 = vsub.f32 %v1548_v28, %v576_v5 }
 0x2ef   :  { %v705_v34 = vadd.f32 %v704_v51, %v703_v9  ;;  %v648_v15 = vmul.f32 %v616_v45, %v616_v45 }
 0x2f0   :  { %v646_v14 = vmul.f32 %v614_v60, %v614_v60 }
 0x2f1   :  { %v710_v46 = vsel %vm650_vm1, %v648_v15, 0.0 }
 0x2f2   :  { %v706_v18 = vsel %vm650_vm1, %v646_v14, 0.0 }
 0x2f3   :  { %v707_v22 = vadd.f32 %v706_v18, %v705_v34 }
 0x2f5   :  { %v585_v2 = vpop.xlane.xlu2 %584  ;;  %v709_v30 = vadd.f32 %v708_v7, %v707_v22 }
 0x2f6   :  { %v617_v56 = vsub.f32 %v339_v49, %v585_v2 }
 0x2f7   :  { %v711_v63 = vadd.f32 %v710_v46, %v709_v30 }
 0x2f8   :  { %v649_v28 = vmul.f32 %v617_v56, %v617_v56 }
 0x2fa   :  { %v712_v8 = vsel %vm650_vm1, %v649_v28, 0.0 }
 0x2fb   :  { %v713_v4 = vadd.f32 %v712_v8, %v711_v63 }
 0x2fd   :  { %714 = vadd.xlane.f32.xlu0 %v713_v4 }
 0x370   :  { %v715_v26 = vpop.xlane.xlu0 %714 }
 0x371   :  { %v716_v13 = vrot.slane %v715_v26, 4 }
 0x373   :  { %v717_v10 = vadd.f32 %v716_v13, %v715_v26 }
 0x375   :  { %v718_v61 = vrot.slane %v717_v10, 2 }
 0x377   :  { %v719_v38 = vadd.f32 %v718_v61, %v717_v10 }
 0x379   :  { %v720_v48 = vrot.slane %v719_v38, 1 }
 0x37b   :  { %v721_v44 = vadd.f32 %v720_v48, %v719_v38 }
 0x37d   :  { %775 = vpush %v721_v44 }
 0x3ae   :  { %s776_s2 = spop %775 }
 0x3af   :  { %v723_v53 = vstv %s776_s2 }
 0x3b0   :  { %808 = vrsqrt.f32 %v723_v53  ;;  %vm731_vm2 = vcmp.eq.f32.partialorder %v723_v53, inf  ;;  %v734_v33 = vand.u32 2147483648, %v723_v53  ;;  %vm733_vm3 = vcmp.eq.f32.partialorder %v723_v53, 0.0 }
 0x3b6   :  { %v809_v62 = vpop.eup %808 }
 0x3b7   :  { %v725_v55 = vmul.f32 %v809_v62, %v723_v53 }
 0x3b9   :  { %v726_v37 = vmul.f32 %v809_v62, %v725_v55 }
 0x3bb   :  { %v727_v20 = vmul.f32 0.5, %v726_v37 }
 0x3bd   :  { %v728_v23 = vsub.f32 1.5, %v727_v20 }
 0x3bf   :  { %v729_v47 = vmul.f32 %v809_v62, %v728_v23 }
 0x3c1   :  { %v730_v58 = vmul.f32 %v729_v47, %v723_v53 }
 0x3c3   :  { %v732_v21 = vsel %vm731_vm2, %v723_v53, %v730_v58 }
 0x3c4   :  { %v735_v43 = vsel %vm733_vm3, %v734_v33, %v732_v21 }
 0x3c5   :  { %777 = vpush %v735_v43 }
 0x3f6   :  { %s778_s26 = spop %777 }
 0x3f7   :  { %s737_s27 = smul.f32 0.03125, %s778_s26 }
 0x3f9   :  { %739 = sst [smem:[#allocation2]] %s737_s27 }
 0x3fa   :  { %748 = dma.smem_to_hbm %s825_s28, 16, %s746_s25, [#allocation3]  }
 0x3fb   :  { %822 = dma.done.wait [#allocation3], 16  }
 0x3fc   :  { %823 = vsyncadd [#allocation3], 4294967280 }
 0x3fd   :  { %753 = sfence }
 0x3fe   :  { %754 = vsyncpa [#allocation3], 1 }

</bundles_post_ra>
